<compile_context>
chip_gen: v7x
topology: tpu7x:2x2x1
jax: 0.10.0
libtpu: 0.0.40
codegen_flags: <defaults>
</compile_context>

<pallas_src>
import functools

import jax
import jax.numpy as jnp
from jax import lax
from jax.experimental import pallas as pl
from jax.experimental.pallas import tpu as pltpu


def _round_up(x, m):
    return ((x + m - 1) // m) * m


def _cdiv(a, b):
    return (a + b - 1) // b


def _pad2(a, rows, cols):
    pr, pc = rows - a.shape[0], cols - a.shape[1]
    if pr or pc:
        a = jnp.pad(a, ((0, pr), (0, pc)))
    return a


def _vmem_capacity_bytes():
    """Per-core VMEM capacity; conservative fallback = 64 MiB (v7x per-TC)."""
    try:
        info = pltpu.get_tpu_info()
        cap = int(getattr(info, "vmem_capacity_bytes", 0) or 0)
        if cap > 0:
            return cap
    except Exception:
        pass
    return 64 << 20


def _pick_th(Hp, cap):
    """Largest multiple of 128 <= cap that divides Hp (Hp is a multiple of 128)."""
    cap = max(128, (min(cap, Hp) // 128) * 128)
    for th in range(cap, 127, -128):
        if Hp % th == 0:
            return th
    return 128


def _ffn_kernel(x_ref, w1_ref, b1_ref, w2t_ref, b2_ref, o_ref, *acc):
    # x_ref:   (tm, Dp)  token tile (compute dtype, e.g. bf16)
    # w1_ref:  (th, Dp)  W1 hidden slice, PyTorch layout (row-contiguous DMA)
    # b1_ref:  (1, th)   f32
    # w2t_ref: (th, Dp)  W2^T hidden slice (row-contiguous, canonical (K,N) form)
    # b2_ref:  (1, Dp)   f32
    # o_ref:   (tm, Dp)  output row tile (VMEM-resident across the j axis)
    # acc:     optional (tm, Dp) f32 scratch; for f32 outputs we accumulate
    #          directly into o_ref and skip the extra scratch buffer.
    acc_ref = acc[0] if acc else o_ref
    j = pl.program_id(1)

    @pl.when(j == 0)
    def _():
        acc_ref[...] = jnp.zeros_like(acc_ref)

    # h = x @ W1^T (contract the feature dim) -> (tm, th), f32 accumulation.
    h = lax.dot_general(
        x_ref[...], w1_ref[...],
        dimension_numbers=(((1,), (1,)), ((), ())),
        preferred_element_type=jnp.float32)
    h = jnp.maximum(h + b1_ref[...], 0.0)  # bias + ReLU in f32

    # partial out += h_tile @ (W2^T)_tile -> (tm, Dp), canonical (M,K)x(K,N).
    acc_ref[...] += lax.dot_general(
        h.astype(w2t_ref.dtype), w2t_ref[...],
        dimension_numbers=(((1,), (0,)), ((), ())),
        preferred_element_type=jnp.float32)

    @pl.when(j == pl.num_programs(1) - 1)
    def _():
        o_ref[...] = (acc_ref[...] + b2_ref[...]).astype(o_ref.dtype)


def prepare_ffn_params(w1, b1, w2, b2, compute_dtype=jnp.bfloat16):
    """One-time weight preparation (cast / pad / transpose) outside the hot path.

    w1: (H, D), b1: (H,), w2: (D, H), b2: (D,)  -- PyTorch nn.Linear layout.
    Returns (w1_p (Hp,Dp), b1_p (1,Hp) f32, w2t_p (Hp,Dp), b2_p (1,Dp) f32).
    """
    H, D = w1.shape
    Dp, Hp = _round_up(D, 128), _round_up(H, 128)
    w1_p = _pad2(w1, Hp, Dp).astype(compute_dtype)            # (H, D) layout kept
    w2t_p = _pad2(w2.T, Hp, Dp).astype(compute_dtype)         # pre-transposed W2
    b1_p = _pad2(b1.astype(jnp.float32).reshape(1, H), 1, Hp)
    b2_p = _pad2(b2.astype(jnp.float32).reshape(1, D), 1, Dp)
    return w1_p, b1_p, w2t_p, b2_p


@functools.partial(jax.jit, static_argnames=("tile_m", "tile_h"))
def feed_forward(x, w1_p, b1_p, w2t_p, b2_p, *, tile_m=512, tile_h=512):
    """x: (..., D). Weights must come from prepare_ffn_params(). Returns x-shaped output."""
    orig_shape = x.shape
    out_dtype = x.dtype
    cd = w1_p.dtype
    D = orig_shape[-1]
    Hp, Dp = w1_p.shape
    assert Dp == _round_up(D, 128), "weights must be prepared with prepare_ffn_params"
    assert w2t_p.shape == (Hp, Dp)

    xm = x.reshape(-1, D)
    M = xm.shape[0]

    c_isz = jnp.dtype(cd).itemsize
    o_isz = jnp.dtype(out_dtype).itemsize
    use_acc = jnp.dtype(out_dtype) != jnp.dtype(jnp.float32)

    # --- generation-aware VMEM budget ---------------------------------------
    capacity = _vmem_capacity_bytes()
    if capacity <= (64 << 20):                       # v7x-class: 64 MiB / TC
        budget = max(capacity - (16 << 20), 24 << 20)
    else:                                            # v5e/v6e: 128 MiB
        budget = min(capacity - (24 << 20), 112 << 20)

    def vmem_est(tm, th):
        est = 2 * tm * Dp * c_isz                    # x tile (double-buffered)
        est += 2 * 2 * th * Dp * c_isz               # W1 + W2^T tiles
        est += 2 * 8 * (th + Dp) * 4                 # biases (sublane-padded f32)
        est += 2 * tm * Dp * o_isz                   # output tile
        if use_acc:
            est += tm * Dp * 4                       # f32 accumulator scratch
        return est

    # --- tile selection: balanced row tile + divisor hidden tile, fit to VMEM ---
    th = _pick_th(Hp, tile_h)
    n_m = max(1, _cdiv(M, tile_m))
    tm = _round_up(_cdiv(M, n_m), 16)                # balanced: avoids mostly-pad last tile
    for _ in range(64):
        if vmem_est(tm, th) <= budget:
            break
        if th > 128:
            th = _pick_th(Hp, th - 128)
        elif tm > 16:
            n_m += 1
            tm = _round_up(_cdiv(M, n_m), 16)
        else:
            break
    Mp = n_m * tm

    xm_p = _pad2(xm, Mp, Dp).astype(cd)

    est = vmem_est(tm, th)
    vmem_limit = min(capacity - (8 << 20),
                     max(32 << 20, int(est * 13 // 10) + (4 << 20)))

    grid = (Mp // tm, Hp // th)
    # Bytes reflect actual weight re-streaming (weights re-read once per row tile).
    cost = pl.CostEstimate(
        flops=int(4 * Mp * Dp * Hp),                 # two GEMMs, 2 flops / MAC
        transcendentals=0,
        bytes_accessed=int(xm_p.size * c_isz
                           + grid[0] * (w1_p.size + w2t_p.size) * c_isz
                           + (b1_p.size + b2_p.size) * 4
                           + Mp * Dp * o_isz))

    scratch = [pltpu.VMEM((tm, Dp), jnp.float32)] if use_acc else []

    # TODO(synk): for v7x small-M decode shapes, a second "parallel" axis over the
    # output-feature dim could engage both TensorCores; skipped (bandwidth-bound
    # regime, duplicated W1 traffic makes it a wash for this FFN).
    out = pl.pallas_call(
        _ffn_kernel,
        out_shape=jax.ShapeDtypeStruct((Mp, Dp), out_dtype),
        grid_spec=pltpu.PrefetchScalarGridSpec(
            num_scalar_prefetch=0,
            grid=grid,
            in_specs=[
                pl.BlockSpec((tm, Dp), lambda i, j: (i, 0)),   # x row tile
                pl.BlockSpec((th, Dp), lambda i, j: (j, 0)),   # W1 hidden slice (contiguous)
                pl.BlockSpec((1, th), lambda i, j: (0, j)),    # b1 slice
                pl.BlockSpec((th, Dp), lambda i, j: (j, 0)),   # W2^T hidden slice (contiguous)
                pl.BlockSpec((1, Dp), lambda i, j: (0, 0)),    # b2
            ],
            out_specs=pl.BlockSpec((tm, Dp), lambda i, j: (i, 0)),
            scratch_shapes=scratch,
        ),
        compiler_params=pltpu.CompilerParams(
            dimension_semantics=("parallel", "arbitrary"),
            vmem_limit_bytes=int(vmem_limit)),
        cost_estimate=cost,
    )(xm_p, w1_p, b1_p, w2t_p, b2_p)

    out = out[:M, :D]
    return out.reshape(orig_shape)


def _init_linear_params(key, out_dim, in_dim, dtype=jnp.float32):
    # Deterministic init mimicking nn.Linear's uniform(-1/sqrt(in), 1/sqrt(in))
    kw, kb = jax.random.split(key)
    bound = 1.0 / jnp.sqrt(jnp.asarray(in_dim, dtype))
    w = jax.random.uniform(kw, (out_dim, in_dim), dtype, -bound, bound)
    b = jax.random.uniform(kb, (out_dim,), dtype, -bound, bound)
    return w, b


if __name__ == "__main__":
    key = jax.random.PRNGKey(0)
    k_x, k_l1, k_l2 = jax.random.split(key, 3)

    batch, seq, input_dim, hidden_dim = 2, 8, 32, 64
    x = jax.random.normal(k_x, (batch, seq, input_dim), jnp.float32)

    w1, b1 = _init_linear_params(k_l1, hidden_dim, input_dim)   # L1: (H, D)
    w2, b2 = _init_linear_params(k_l2, input_dim, hidden_dim)   # L2: (D, H)

    # One-time weight preparation (cast / pad / transpose) outside the hot path.
    params = prepare_ffn_params(w1, b1, w2, b2)

    out = feed_forward(x, *params)
    out = jax.block_until_ready(out)

    # Reference with matching bf16-compute / f32-accumulate precision.
    cd = jnp.bfloat16
    h_ref = jnp.dot(x.astype(cd), w1.astype(cd).T,
                    preferred_element_type=jnp.float32) + b1
    h_ref = jnp.maximum(h_ref, 0.0)
    ref = jnp.dot(h_ref.astype(cd), w2.astype(cd).T,
                  preferred_element_type=jnp.float32) + b2
    ref = ref.astype(x.dtype)

    assert out.shape == x.shape
    assert jnp.allclose(out, ref, atol=2e-3, rtol=2e-3), "mismatch vs reference"

    print("KERNEL_OK")
</pallas_src>

<mosaic_0001>
module attributes {stable_mosaic.version = 11 : i64} {
  func.func @_ffn_kernel(%arg0: i32, %arg1: i32, %arg2: memref<16x128xbf16, #tpu.memory_space<vmem>>, %arg3: memref<128x128xbf16, #tpu.memory_space<vmem>>, %arg4: memref<1x128xf32, #tpu.memory_space<vmem>>, %arg5: memref<128x128xbf16, #tpu.memory_space<vmem>>, %arg6: memref<1x128xf32, #tpu.memory_space<vmem>>, %arg7: memref<16x128xf32, #tpu.memory_space<vmem>>) attributes {dimension_semantics = [#tpu.dimension_semantics<parallel>, #tpu.dimension_semantics<arbitrary>], iteration_bounds = array<i64: 1, 1>, scalar_prefetch = 0 : i64, scratch_operands = 0 : i64, tpu.core_type = #tpu.core_type<tc>, window_params = [{transform_indices = @transform_0, window_bounds = array<i64: 16, 128>}, {transform_indices = @transform_1, window_bounds = array<i64: 128, 128>}, {transform_indices = @transform_2, window_bounds = array<i64: 1, 128>}, {transform_indices = @transform_3, window_bounds = array<i64: 128, 128>}, {pipeline_mode = #tpu.pipeline_mode<synchronous>, transform_indices = @transform_4, window_bounds = array<i64: 1, 128>}, {transform_indices = @transform_5, window_bounds = array<i64: 16, 128>}]} {
    %c0_i32 = arith.constant 0 : i32
    %0 = arith.cmpi eq, %arg1, %c0_i32 : i32
    %1 = arith.extui %0 : i1 to i32
    %c0_i32_0 = arith.constant 0 : i32
    %2 = arith.cmpi ne, %1, %c0_i32_0 : i32
    scf.if %2 {
      %cst_16 = arith.constant 0.000000e+00 : f32
      %20 = vector.broadcast %cst_16 : f32 to vector<16x128xf32>
      %c0_17 = arith.constant 0 : index
      %c0_18 = arith.constant 0 : index
      %21 = vector.load %arg7[%c0_17, %c0_18] : memref<16x128xf32, #tpu.memory_space<vmem>>, vector<16x128xf32>
      tpu.vector_store %arg7[%c0_17, %c0_18], %20 {strides = array<i32>} : memref<16x128xf32, #tpu.memory_space<vmem>>, vector<16x128xf32>,
    } else {
    }
    %c0 = arith.constant 0 : index
    %c0_1 = arith.constant 0 : index
    %3 = vector.load %arg2[%c0, %c0_1] : memref<16x128xbf16, #tpu.memory_space<vmem>>, vector<16x128xbf16>
    %c0_2 = arith.constant 0 : index
    %c0_3 = arith.constant 0 : index
    %4 = vector.load %arg3[%c0_2, %c0_3] : memref<128x128xbf16, #tpu.memory_space<vmem>>, vector<128x128xbf16>
    %cst = arith.constant dense<0.000000e+00> : vector<16x128xf32>
    %5 = tpu.matmul %3, %4, %cst {dimension_numbers = #tpu.dot_dimension_numbers<[1], [1], [0], [0], [0, 0, 1, 0], [], []>} : vector<16x128xbf16>, vector<128x128xbf16>, vector<16x128xf32> -> vector<16x128xf32>
    %c0_4 = arith.constant 0 : index
    %c0_5 = arith.constant 0 : index
    %6 = vector.load %arg4[%c0_4, %c0_5] : memref<1x128xf32, #tpu.memory_space<vmem>>, vector<1x128xf32>
    %7 = vector.broadcast %6 : vector<1x128xf32> to vector<16x128xf32>
    %8 = arith.addf %5, %7 : vector<16x128xf32>
    %cst_6 = arith.constant 0.000000e+00 : f32
    %9 = vector.broadcast %cst_6 : f32 to vector<16x128xf32>
    %10 = arith.maximumf %8, %9 : vector<16x128xf32>
    %c0_7 = arith.constant 0 : index
    %c0_8 = arith.constant 0 : index
    %11 = vector.load %arg7[%c0_7, %c0_8] : memref<16x128xf32, #tpu.memory_space<vmem>>, vector<16x128xf32>
    %12 = arith.truncf %10 : vector<16x128xf32> to vector<16x128xbf16>
    %c0_9 = arith.constant 0 : index
    %c0_10 = arith.constant 0 : index
    %13 = vector.load %arg5[%c0_9, %c0_10] : memref<128x128xbf16, #tpu.memory_space<vmem>>, vector<128x128xbf16>
    %cst_11 = arith.constant dense<0.000000e+00> : vector<16x128xf32>
    %14 = tpu.matmul %12, %13, %cst_11 {dimension_numbers = #tpu.dot_dimension_numbers<[1], [0], [0], [1], [0, 0, 1, 1], [], []>} : vector<16x128xbf16>, vector<128x128xbf16>, vector<16x128xf32> -> vector<16x128xf32>
    %15 = arith.addf %11, %14 : vector<16x128xf32>
    %c0_12 = arith.constant 0 : index
    %c0_13 = arith.constant 0 : index
    %16 = vector.load %arg7[%c0_12, %c0_13] : memref<16x128xf32, #tpu.memory_space<vmem>>, vector<16x128xf32>
    tpu.vector_store %arg7[%c0_12, %c0_13], %15 {strides = array<i32>} : memref<16x128xf32, #tpu.memory_space<vmem>>, vector<16x128xf32>,
    %c0_i32_14 = arith.constant 0 : i32
    %17 = arith.cmpi eq, %arg1, %c0_i32_14 : i32
    %18 = arith.extui %17 : i1 to i32
    %c0_i32_15 = arith.constant 0 : i32
    %19 = arith.cmpi ne, %18, %c0_i32_15 : i32
    scf.if %19 {
      %c0_16 = arith.constant 0 : index
      %c0_17 = arith.constant 0 : index
      %20 = vector.load %arg7[%c0_16, %c0_17] : memref<16x128xf32, #tpu.memory_space<vmem>>, vector<16x128xf32>
      %c0_18 = arith.constant 0 : index
      %c0_19 = arith.constant 0 : index
      %21 = vector.load %arg6[%c0_18, %c0_19] : memref<1x128xf32, #tpu.memory_space<vmem>>, vector<1x128xf32>
      %22 = vector.broadcast %21 : vector<1x128xf32> to vector<16x128xf32>
      %23 = arith.addf %20, %22 : vector<16x128xf32>
      %c0_20 = arith.constant 0 : index
      %c0_21 = arith.constant 0 : index
      %24 = vector.load %arg7[%c0_20, %c0_21] : memref<16x128xf32, #tpu.memory_space<vmem>>, vector<16x128xf32>
      tpu.vector_store %arg7[%c0_20, %c0_21], %23 {strides = array<i32>} : memref<16x128xf32, #tpu.memory_space<vmem>>, vector<16x128xf32>,
    } else {
    }
    return
  }
  func.func @transform_0(%arg0: i32, %arg1: i32) -> (i32, i32) {
    %c0_i32 = arith.constant 0 : i32
    %c0_i32_0 = arith.constant 0 : i32
    return %arg0, %c0_i32 : i32, i32
  }
  func.func @transform_1(%arg0: i32, %arg1: i32) -> (i32, i32) {
    %c0_i32 = arith.constant 0 : i32
    %c0_i32_0 = arith.constant 0 : i32
    return %arg1, %c0_i32 : i32, i32
  }
  func.func @transform_2(%arg0: i32, %arg1: i32) -> (i32, i32) {
    %c0_i32 = arith.constant 0 : i32
    %c0_i32_0 = arith.constant 0 : i32
    return %c0_i32, %arg1 : i32, i32
  }
  func.func @transform_3(%arg0: i32, %arg1: i32) -> (i32, i32) {
    %c0_i32 = arith.constant 0 : i32
    %c0_i32_0 = arith.constant 0 : i32
    return %arg1, %c0_i32 : i32, i32
  }
  func.func @transform_4(%arg0: i32, %arg1: i32) -> (i32, i32) {
    %c0_i32 = arith.constant 0 : i32
    %c0_i32_0 = arith.constant 0 : i32
    %c0_i32_1 = arith.constant 0 : i32
    return %c0_i32, %c0_i32_0 : i32, i32
  }
  func.func @transform_5(%arg0: i32, %arg1: i32) -> (i32, i32) {
    %c0_i32 = arith.constant 0 : i32
    %c0_i32_0 = arith.constant 0 : i32
    return %arg0, %c0_i32 : i32, i32
  }
}

</mosaic_0001>

<bundles_post_ra>
// kernel: feed_forward.1
= control target key start
LH: loop header
LB: loop body
LE: loop exit
PB: predicated region body
PF: predicated region fallthrough
CT: control target
= control target key end

     0   :  { %10 = vsyncpa [#allocation3], 0  ;;  %s534_s0 = inlined_call_operand.vmem [shape: bf16[16,128], index: 0, kind: input, shape index: {}]   ;;  %s535_s1 = inlined_call_operand.hbm [shape: bf16[128,128], index: 1, kind: input, shape index: {}]   ;;  %s536_s2 = inlined_call_operand.vmem [shape: f32[1,128], index: 2, kind: input, shape index: {}]   ;;  %s537_s3 = inlined_call_operand.hbm [shape: bf16[128,128], index: 3, kind: input, shape index: {}]   ;;  %s538_s4 = inlined_call_operand.vmem [shape: f32[1,128], index: 4, kind: input, shape index: {}]   ;;  %s539_s5 = inlined_call_operand.vmem [shape: f32[16,128], index: 5, kind: output, shape index: {}]  }
   0x1   :  { %11 = vsyncpa [#allocation5], 0  ;;  %s459_s18 = smov [#allocation2]   ;;  %s411_s22 = scalar_lea.hbm %s535_s1, 1024 }
   0x2   :  { %s19_s19 = sshll.u32 %s459_s18, 4  ;;  %p412_p0 = scmp.ne.s32.totalorder %s535_s1, %s411_s22  ;;  %s20_s19 = int_to_ptr.vmem [resolvable:$true] %s19_s19 }
   0x3   :  { %p415_p1 = scmp.lt.u32.totalorder %s411_s22, %s535_s1 }
   0x5   :  { %p417_p2 = pnand %p415_p1, %p412_p0 }
   0x7   :  { %420 = shalt.err (!%p417_p2)
}
   0x8   :  { %s421_s27 = scalar_lea.vmem %s20_s19, 1024  ;;  %p426_p4 = scmp.lt.s32.totalorder %s20_s19, %s20_s19 }
   0x9   :  { %p422_p3 = scmp.ne.s32.totalorder %s20_s19, %s421_s27  ;;  %p427_p5 = scmp.lt.s32.totalorder %s421_s27, %s421_s27 }
   0xb   :  { %p428_p6 = por %p427_p5, %p426_p4 }
   0xd   :  { %p429_p7 = pnand %p428_p6, %p422_p3 }
   0xf   :  { %432 = shalt.err (!%p429_p7)
}
  0x10   :  { %s460_s28 = smov 64   ;;  %s461_s29 = smov 4  }
  0x11   :  { %25 = dma.hbm_to_vmem [thread:$0]  %s535_s1, 1024, %s20_s19, [#allocation3], %s460_s28, %s460_s28, %s461_s29  }
  0x12   :  { %s462_s7 = smov [#allocation4]   ;;  %s433_s11 = scalar_lea.hbm %s537_s3, 1024 }
  0x13   :  { %s33_s8 = sshll.u32 %s462_s7, 4  ;;  %p434_p8 = scmp.ne.s32.totalorder %s537_s3, %s433_s11  ;;  %s34_s8 = int_to_ptr.vmem [resolvable:$true] %s33_s8 }
  0x14   :  { %p437_p9 = scmp.lt.u32.totalorder %s433_s11, %s537_s3 }
  0x16   :  { %p439_p10 = pnand %p437_p9, %p434_p8 }
  0x18   :  { %442 = shalt.err (!%p439_p10)
}
  0x19   :  { %s443_s16 = scalar_lea.vmem %s34_s8, 1024  ;;  %p448_p12 = scmp.lt.s32.totalorder %s34_s8, %s34_s8 }
  0x1a   :  { %p444_p11 = scmp.ne.s32.totalorder %s34_s8, %s443_s16  ;;  %p449_p13 = scmp.lt.s32.totalorder %s443_s16, %s443_s16 }
  0x1c   :  { %p450_p0 = por %p449_p13, %p448_p12 }
  0x1e   :  { %p451_p1 = pnand %p450_p0, %p444_p11 }
  0x20   :  { %454 = shalt.err (!%p451_p1)
}
  0x21   :  { %39 = dma.hbm_to_vmem [thread:$0]  %s537_s3, 1024, %s34_s8, [#allocation5], %s460_s28, %s460_s28, %s461_s29  }
  0x22   :  { %455 = dma.done.wait [#allocation3], 1024  }
  0x23   :  { %456 = vsyncadd [#allocation3], 4294966272 }
  0x24   :  { %457 = dma.done.wait [#allocation5], 1024  }
  0x25   :  { %458 = vsyncadd [#allocation5], 4294966272  ;;  %v463_v0 = vmov 0.0   ;;  %vm464_vm0 = vmmov 0   ;;  %v394_v1 = vld [vmem:[#allocation2] sm:$0xff]   ;;  %v395_v2 = vld [vmem:[#allocation2 + $0x8] sm:$0xff]  }
  0x26   :  { %348 = vmatprep.subr.bf16.mxu0 %v463_v0  ;;  %364 = vmatprep.mubr.msk.bf16.mxu0 %vm464_vm0, %v463_v0  ;;  %v403_v3 = vld [vmem:[#allocation4] sm:$0xff]   ;;  %v404_v4 = vld [vmem:[#allocation4 + $0x8] sm:$0xff]   ;;  %v396_v5 = vld [vmem:[#allocation2 + $0x10] sm:$0xff]  }
  0x27   :  { %368 = vmatprep.subr.bf16.mxu1 %v463_v0  ;;  %384 = vmatprep.mubr.msk.bf16.mxu1 %vm464_vm0, %v463_v0  ;;  %v405_v6 = vld [vmem:[#allocation4 + $0x10] sm:$0xff]   ;;  %v406_v7 = vld [vmem:[#allocation4 + $0x18] sm:$0xff]   ;;  %v407_v9 = vld [vmem:[#allocation4 + $0x20] sm:$0xff]  }
  0x28   :  { %349 = vmatpush3.bf16.xpose.msra.mxu0 %v394_v1  ;;  %369 = vmatpush3.bf16.msra.mxu1 %v403_v3  ;;  %v397_v8 = vld [vmem:[#allocation2 + $0x18] sm:$0xff]   ;;  %v408_v10 = vld [vmem:[#allocation4 + $0x28] sm:$0xff]   ;;  %v398_v11 = vld [vmem:[#allocation2 + $0x20] sm:$0xff]  }
  0x29   :  { %350 = vmatprep.subr.bf16.mxu0 %v463_v0  ;;  %370 = vmatprep.subr.bf16.mxu1 %v463_v0  ;;  %v399_v12 = vld [vmem:[#allocation2 + $0x28] sm:$0xff]   ;;  %v400_v13 = vld [vmem:[#allocation2 + $0x30] sm:$0xff]   ;;  %v401_v14 = vld [vmem:[#allocation2 + $0x38] sm:$0xff]  }
  0x2a   :  { %v402_v15 = vld [vmem:[%s534_s0] sm:$0xff]   ;;  %v409_v16 = vld [vmem:[#allocation4 + $0x30] sm:$0xff]   ;;  %v410_v17 = vld [vmem:[#allocation4 + $0x38] sm:$0xff]  }
  0x2b   :  { %v311_v18 = vld [vmem:[%s536_s2] ss:$0 sm:$0xff] }
  0x2c   :  { %371 = vmatpush3.bf16.msra.mxu1 %v404_v4  ;;  %v329_v29 = vld [vmem:[%s538_s4] ss:$0 sm:$0xff] }
  0x2d   :  { %372 = vmatprep.subr.bf16.mxu1 %v463_v0 }
  0x30   :  { %351 = vmatpush3.bf16.xpose.msra.mxu0 %v395_v2  ;;  %373 = vmatpush3.bf16.msra.mxu1 %v405_v6 }
  0x31   :  { %352 = vmatprep.subr.bf16.mxu0 %v463_v0  ;;  %374 = vmatprep.subr.bf16.mxu1 %v463_v0 }
  0x34   :  { %375 = vmatpush3.bf16.msra.mxu1 %v406_v7 }
  0x35   :  { %376 = vmatprep.subr.bf16.mxu1 %v463_v0 }
  0x38   :  { %353 = vmatpush3.bf16.xpose.msra.mxu0 %v396_v5  ;;  %377 = vmatpush3.bf16.msra.mxu1 %v407_v9 }
  0x39   :  { %354 = vmatprep.subr.bf16.mxu0 %v463_v0  ;;  %378 = vmatprep.subr.bf16.mxu1 %v463_v0 }
  0x3c   :  { %379 = vmatpush3.bf16.msra.mxu1 %v408_v10 }
  0x3d   :  { %380 = vmatprep.subr.bf16.mxu1 %v463_v0 }
  0x40   :  { %355 = vmatpush3.bf16.xpose.msra.mxu0 %v397_v8  ;;  %381 = vmatpush3.bf16.msra.mxu1 %v409_v16 }
  0x41   :  { %356 = vmatprep.subr.bf16.mxu0 %v463_v0  ;;  %382 = vmatprep.subr.bf16.mxu1 %v463_v0 }
  0x44   :  { %383 = vmatpush3.bf16.msra.mxu1 %v410_v17 }
  0x48   :  { %357 = vmatpush3.bf16.xpose.msra.mxu0 %v398_v11 }
  0x49   :  { %358 = vmatprep.subr.bf16.mxu0 %v463_v0 }
  0x50   :  { %359 = vmatpush3.bf16.xpose.msra.mxu0 %v399_v12 }
  0x51   :  { %360 = vmatprep.subr.bf16.mxu0 %v463_v0 }
  0x58   :  { %361 = vmatpush3.bf16.xpose.msra.mxu0 %v400_v13 }
  0x59   :  { %362 = vmatprep.subr.bf16.mxu0 %v463_v0 }
  0x60   :  { %363 = vmatpush3.bf16.xpose.msra.mxu0 %v401_v14 }
  0x67   :  { %365 = vmatmul.mubr.bf16.vlgmr.msra.gmra.mrb[0].mxu0 %v402_v15 }
 0x13a   :  { %v168_v19 = vpop.f32.mrb[0].mxu0 }
 0x13b   :  { %v169_v20 = vadd.f32 %v311_v18, %v168_v19  ;;  %v366_v21 = vpop.f32.mrb[1].mxu0 }
 0x13c   :  { %v171_v22 = vpop.f32.mrb[2].mxu0 }
 0x13d   :  { %v172_v23 = vadd.f32 %v311_v18, %v171_v22  ;;  %v367_v24 = vpop.f32.mrb[3].mxu0  ;;  %v175_v25 = vmax.f32 %v169_v20, 0.0 }
 0x13f   :  { %v176_v26 = vmax.f32 %v172_v23, 0.0 }
 0x141   :  { %v179_v27 = vpack.c.bf16 %v176_v26, %v175_v25 }
 0x143   :  { %385 = vmatmul.mubr.bf16.vlgmr.msra.gmra.mrb[0].mxu1 %v179_v27 }
 0x216   :  { %v278_v28 = vpop.f32.mrb[0].mxu1 }
 0x217   :  { %v386_v30 = vpop.f32.mrb[1].mxu1  ;;  %v301_v32 = vadd.f32 %v329_v29, %v278_v28 }
 0x218   :  { %v281_v31 = vpop.f32.mrb[2].mxu1 }
 0x219   :  { %v387_v33 = vpop.f32.mrb[3].mxu1  ;;  %303 = vst [vmem:[%s539_s5] sm:$0xff] %v301_v32  ;;  %v302_v34 = vadd.f32 %v329_v29, %v281_v31 }
 0x21b   :  { %304 = vst [vmem:[%s539_s5 + $0x8] sm:$0xff] %v302_v34 }
 0x21c   :  { %309 = vsyncpa [#allocation3], 1 }
 0x21d   :  { %310 = vsyncpa [#allocation5], 1 }

</bundles_post_ra>
